<compile_context>
chip_gen: v6e
topology: v6e:2x2x1
jax: 0.10.0
libtpu: 0.0.40
codegen_flags: <defaults>
</compile_context>

<pallas_src>
import functools

import numpy as np
import jax
import jax.numpy as jnp
from jax.experimental import pallas as pl
from jax.experimental.pallas import tpu as pltpu

LANE = 128  # TPU lane width; pad num_classes up to this for lane-dense output


def _round_up(n, m):
    return (n + m - 1) // m * m


# ------------------------- one-time parameter prep ---------------------------
def prepare_moe_params(params, compute_dtype=jnp.bfloat16):
    """Restack expert weights once (outside the per-call hot path).

    Returns a dict of device arrays:
      wg (D,E) f32, bg (1,E) f32                       gating (stays in XLA)
      w1s (D, E*H) compute_dtype                       stacked expert layer-1
      b1s (1, E*H) f32
      w2s (E*H, Cp) compute_dtype                      stacked expert layer-2
      b2p (E, Cp) f32                                  padded layer-2 bias
      expander (E, E*H) f32                            one-hot cw -> per-column scale
    """
    w1, b1, w2, b2 = params["w1"], params["b1"], params["w2"], params["b2"]
    E, D, H = w1.shape
    C = w2.shape[2]
    Cp = _round_up(C, LANE)

    w1s = jnp.transpose(w1, (1, 0, 2)).reshape(D, E * H).astype(compute_dtype)
    b1s = b1.reshape(1, E * H).astype(jnp.float32)
    w2s = jnp.pad(w2.reshape(E * H, C), ((0, 0), (0, Cp - C))).astype(compute_dtype)
    b2p = jnp.pad(b2, ((0, 0), (0, Cp - C))).astype(jnp.float32)

    # expander[e, l] = 1 iff l // H == e  (trace-time numpy constant, not in-kernel iota)
    expander = jnp.asarray(
        (np.arange(E * H)[None, :] // H == np.arange(E)[:, None]).astype(np.float32)
    )

    return {
        "wg": params["wg"].astype(jnp.float32),
        "bg": params["bg"].astype(jnp.float32),
        "w1s": w1s,
        "b1s": b1s,
        "w2s": w2s,
        "b2p": b2p,
        "expander": expander,
    }


# ----------------------- fused expert + combine kernel -----------------------
def moe_fused_kernel(x_ref, cw_ref, w1s_ref, b1s_ref, w2s_ref, b2p_ref, exp_ref,
                     out_ref, acc_ref):
    """Grid: (token tiles [parallel], expert/K tiles [arbitrary]).

    Per (i, k) step, for the k-th group of experts:
      h   = relu(x @ W1_tile + b1_tile)            (TM, G*H), f32 accum
      h  *= cw @ expander_tile                     per-column expert gate
      acc+= h @ W2_tile                            (TM, Cp) f32 accumulator
    acc is initialized to the gate-weighted layer-2 bias (cw @ b2p) at k==0 and
    written to out at the last k.
    """
    k = pl.program_id(1)

    @pl.when(k == 0)
    def _init():
        # gate-weighted second-layer bias: sum_e cw[b,e] * b2[e,:]
        acc_ref[...] = jnp.dot(cw_ref[...], b2p_ref[...],
                               preferred_element_type=jnp.float32)

    # Layer 1 (small K=D dot; f32 accumulation out of the MXU).
    h = jnp.dot(x_ref[...], w1s_ref[...], preferred_element_type=jnp.float32)
    h = jnp.maximum(h + b1s_ref[...], 0.0)

    # Expand combine weights (TM, E) -> (TM, G*H) with the precomputed one-hot
    # expander tile; keeps everything lane-dense, no relayouts.
    scale = jnp.dot(cw_ref[...], exp_ref[...], preferred_element_type=jnp.float32)
    h = h * scale  # VPU elementwise, f32

    # Layer 2 (the only dot with meaningful MXU cycles, K = G*H).
    acc_ref[...] += jnp.dot(h.astype(w2s_ref.dtype), w2s_ref[...],
                            preferred_element_type=jnp.float32)

    @pl.when(k == pl.num_programs(1) - 1)
    def _store():
        out_ref[...] = acc_ref[...].astype(out_ref.dtype)


def moe_experts_combine(x, prepared, cw, *, num_classes, experts_per_tile=None):
    """x:(B,D) f32, cw:(B,E) f32, prepared weights -> (B, num_classes) f32."""
    w1s, b1s = prepared["w1s"], prepared["b1s"]
    w2s, b2p = prepared["w2s"], prepared["b2p"]
    expander = prepared["expander"]

    B, D = x.shape
    E, Cp = b2p.shape
    EH = w1s.shape[1]
    H = EH // E
    C = num_classes
    compute_dtype = w1s.dtype

    # Expert/K tiling of the second matmul (sized for v7x's 64 MiB VMEM at
    # production E*H; exercised here with >1 tile to validate the accumulator).
    G = E if experts_per_tile is None else experts_per_tile
    assert E % G == 0

    # Token tiling: full-height MXU tiles when B grows; tiny tile for toy B.
    TM = min(_round_up(B, 8), 256)
    Bp = _round_up(B, TM)
    if Bp != B:
        x = jnp.pad(x, ((0, Bp - B), (0, 0)))
        cw = jnp.pad(cw, ((0, Bp - B), (0, 0)))
    x = x.astype(compute_dtype)
    cw = cw.astype(jnp.float32)

    grid = (Bp // TM, E // G)

    out_padded = pl.pallas_call(
        moe_fused_kernel,
        out_shape=jax.ShapeDtypeStruct((Bp, Cp), jnp.float32),
        grid_spec=pltpu.PrefetchScalarGridSpec(
            num_scalar_prefetch=0,
            grid=grid,
            in_specs=[
                pl.BlockSpec((TM, D), lambda i, k: (i, 0)),        # x
                pl.BlockSpec((TM, E), lambda i, k: (i, 0)),        # cw (resident over k)
                pl.BlockSpec((D, G * H), lambda i, k: (0, k)),     # W1 tile
                pl.BlockSpec((1, G * H), lambda i, k: (0, k)),     # b1 tile
                pl.BlockSpec((G * H, Cp), lambda i, k: (k, 0)),    # W2 tile
                pl.BlockSpec((E, Cp), lambda i, k: (0, 0)),        # b2 (resident)
                pl.BlockSpec((E, G * H), lambda i, k: (0, k)),     # expander tile
            ],
            out_specs=pl.BlockSpec((TM, Cp), lambda i, k: (i, 0)),
            scratch_shapes=[pltpu.VMEM((TM, Cp), jnp.float32)],
        ),
        compiler_params=pltpu.CompilerParams(
            dimension_semantics=("parallel", "arbitrary"),
        ),
    )(x, cw, w1s, b1s, w2s, b2p, expander)
    return out_padded[:B, :C]


# ------------------------------- full forward --------------------------------
def moe_forward(prepared, x, *, top_k, num_classes, experts_per_tile=None):
    E = prepared["b2p"].shape[0]

    # Gating: trivially small linear + softmax + top_k -> leave to XLA (no clean
    # in-kernel top_k); only dense combine weights enter the Pallas kernel.
    scores = x @ prepared["wg"] + prepared["bg"]
    probs = jax.nn.softmax(scores, axis=1)
    gates, indices = jax.lax.top_k(probs, top_k)                 # (B, K), (B, K)

    # combine weights cw[b, e] = sum_j gates[b, j] * (indices[b, j] == e)
    one_hot = jax.nn.one_hot(indices, E, dtype=jnp.float32)      # (B, K, E)
    cw = jnp.einsum("bke,bk->be", one_hot, gates)                # (B, E)

    out = moe_experts_combine(x, prepared, cw, num_classes=num_classes,
                              experts_per_tile=experts_per_tile)  # (B, C)

    # gates.unsqueeze(-1).expand(-1,-1,C).sum(0) == broadcast(gates.sum(0), (K, C))
    gates_sum = jnp.broadcast_to(gates.sum(axis=0)[:, None], (top_k, num_classes))
    return out, gates_sum


# ------------------------------ reference (JAX) -------------------------------
def moe_reference(params, x, top_k):
    scores = x @ params["wg"] + params["bg"]
    probs = jax.nn.softmax(scores, axis=1)
    gates, indices = jax.lax.top_k(probs, top_k)
    B = x.shape[0]
    C = params["w2"].shape[2]

    def expert_apply(e, xi):
        h = jnp.maximum(xi @ params["w1"][e] + params["b1"][e], 0.0)
        return h @ params["w2"][e] + params["b2"][e]

    all_y = jax.vmap(lambda e: expert_apply(e, x))(jnp.arange(params["w1"].shape[0]))
    picked = all_y[indices, jnp.arange(B)[:, None], :]            # (B, K, C)
    out = (gates[:, :, None] * picked).sum(axis=1)
    gates_sum = jnp.broadcast_to(gates[:, :, None], (B, top_k, C)).sum(axis=0)
    return out, gates_sum


# ---------------------------------- main --------------------------------------
if __name__ == "__main__":
    B = 8            # batch
    D = 32           # input_dim
    E = 4            # num_experts
    K = 2            # top_k
    C = 10           # num_classes
    H = 128          # Expert hidden dim (fixed by the module)

    key = jax.random.PRNGKey(0)
    ks = jax.random.split(key, 8)
    params = {
        "wg": jax.random.normal(ks[0], (D, E), jnp.float32) * 0.1,
        "bg": jax.random.normal(ks[1], (1, E), jnp.float32) * 0.1,
        "w1": jax.random.normal(ks[2], (E, D, H), jnp.float32) * 0.1,
        "b1": jax.random.normal(ks[3], (E, H), jnp.float32) * 0.1,
        "w2": jax.random.normal(ks[4], (E, H, C), jnp.float32) * 0.1,
        "b2": jax.random.normal(ks[5], (E, C), jnp.float32) * 0.1,
    }
    x = jax.random.normal(ks[6], (B, D), jnp.float32)

    ref_out, ref_gates_sum = moe_reference(params, x, K)

    # --- f32 path (tight check; also exercises the K/expert-tile accumulator) ---
    prep_f32 = prepare_moe_params(params, compute_dtype=jnp.float32)
    fwd_f32 = jax.jit(functools.partial(
        moe_forward, top_k=K, num_classes=C, experts_per_tile=2))
    out, gates_sum = fwd_f32(prep_f32, x)
    out = jax.block_until_ready(out)
    gates_sum = jax.block_until_ready(gates_sum)
    assert out.shape == (B, C) and gates_sum.shape == (K, C)
    assert jnp.allclose(out, ref_out, atol=1e-4, rtol=1e-4)
    assert jnp.allclose(gates_sum, ref_gates_sum, atol=1e-4, rtol=1e-4)

    # --- bf16 MXU-operand path (production dtype; f32 accumulation) ---
    prep_bf16 = prepare_moe_params(params, compute_dtype=jnp.bfloat16)
    fwd_bf16 = jax.jit(functools.partial(
        moe_forward, top_k=K, num_classes=C, experts_per_tile=2))
    out_bf16, gates_sum_bf16 = fwd_bf16(prep_bf16, x)
    out_bf16 = jax.block_until_ready(out_bf16)
    gates_sum_bf16 = jax.block_until_ready(gates_sum_bf16)
    assert jnp.allclose(out_bf16, ref_out, atol=3e-2, rtol=3e-2)
    assert jnp.allclose(gates_sum_bf16, ref_gates_sum, atol=1e-4, rtol=1e-4)

    print("KERNEL_OK")
</pallas_src>

<mosaic_0001>
module attributes {stable_mosaic.version = 11 : i64} {
  func.func @moe_fused_kernel(%arg0: i32, %arg1: i32, %arg2: memref<8x32xf32, #tpu.memory_space<vmem>>, %arg3: memref<8x4xf32, #tpu.memory_space<vmem>>, %arg4: memref<32x256xf32, #tpu.memory_space<vmem>>, %arg5: memref<1x256xf32, #tpu.memory_space<vmem>>, %arg6: memref<256x128xf32, #tpu.memory_space<vmem>>, %arg7: memref<4x128xf32, #tpu.memory_space<vmem>>, %arg8: memref<4x256xf32, #tpu.memory_space<vmem>>, %arg9: memref<8x128xf32, #tpu.memory_space<vmem>>, %arg10: memref<8x128xf32, #tpu.memory_space<vmem>>) attributes {dimension_semantics = [#tpu.dimension_semantics<parallel>, #tpu.dimension_semantics<arbitrary>], iteration_bounds = array<i64: 1, 2>, scalar_prefetch = 0 : i64, scratch_operands = 1 : i64, tpu.core_type = #tpu.core_type<tc>, window_params = [{transform_indices = @transform_0, window_bounds = array<i64: 8, 32>}, {transform_indices = @transform_1, window_bounds = array<i64: 8, 4>}, {transform_indices = @transform_2, window_bounds = array<i64: 32, 256>}, {transform_indices = @transform_3, window_bounds = array<i64: 1, 256>}, {transform_indices = @transform_4, window_bounds = array<i64: 256, 128>}, {pipeline_mode = #tpu.pipeline_mode<synchronous>, transform_indices = @transform_5, window_bounds = array<i64: 4, 128>}, {transform_indices = @transform_6, window_bounds = array<i64: 4, 256>}, {transform_indices = @transform_7, window_bounds = array<i64: 8, 128>}]} {
    %c0_i32 = arith.constant 0 : i32
    %0 = arith.cmpi eq, %arg1, %c0_i32 : i32
    %1 = arith.extui %0 : i1 to i32
    %c0_i32_0 = arith.constant 0 : i32
    %2 = arith.cmpi ne, %1, %c0_i32_0 : i32
    scf.if %2 {
      %c0_20 = arith.constant 0 : index
      %c0_21 = arith.constant 0 : index
      %23 = vector.load %arg3[%c0_20, %c0_21] : memref<8x4xf32, #tpu.memory_space<vmem>>, vector<8x4xf32>
      %c0_22 = arith.constant 0 : index
      %c0_23 = arith.constant 0 : index
      %24 = vector.load %arg7[%c0_22, %c0_23] : memref<4x128xf32, #tpu.memory_space<vmem>>, vector<4x128xf32>
      %cst_24 = arith.constant dense<0.000000e+00> : vector<8x128xf32>
      %25 = tpu.matmul %23, %24, %cst_24 {dimension_numbers = #tpu.dot_dimension_numbers<[1], [0], [0], [1], [0, 0, 1, 1], [], []>} : vector<8x4xf32>, vector<4x128xf32>, vector<8x128xf32> -> vector<8x128xf32>
      %c0_25 = arith.constant 0 : index
      %c0_26 = arith.constant 0 : index
      %26 = vector.load %arg10[%c0_25, %c0_26] : memref<8x128xf32, #tpu.memory_space<vmem>>, vector<8x128xf32>
      tpu.vector_store %arg10[%c0_25, %c0_26], %25 {strides = array<i32>} : memref<8x128xf32, #tpu.memory_space<vmem>>, vector<8x128xf32>,
    } else {
    }
    %c0 = arith.constant 0 : index
    %c0_1 = arith.constant 0 : index
    %3 = vector.load %arg2[%c0, %c0_1] : memref<8x32xf32, #tpu.memory_space<vmem>>, vector<8x32xf32>
    %c0_2 = arith.constant 0 : index
    %c0_3 = arith.constant 0 : index
    %4 = vector.load %arg4[%c0_2, %c0_3] : memref<32x256xf32, #tpu.memory_space<vmem>>, vector<32x256xf32>
    %cst = arith.constant dense<0.000000e+00> : vector<8x256xf32>
    %5 = tpu.matmul %3, %4, %cst {dimension_numbers = #tpu.dot_dimension_numbers<[1], [0], [0], [1], [0, 0, 1, 1], [], []>} : vector<8x32xf32>, vector<32x256xf32>, vector<8x256xf32> -> vector<8x256xf32>
    %c0_4 = arith.constant 0 : index
    %c0_5 = arith.constant 0 : index
    %6 = vector.load %arg5[%c0_4, %c0_5] : memref<1x256xf32, #tpu.memory_space<vmem>>, vector<1x256xf32>
    %7 = vector.broadcast %6 : vector<1x256xf32> to vector<8x256xf32>
    %8 = arith.addf %5, %7 : vector<8x256xf32>
    %cst_6 = arith.constant 0.000000e+00 : f32
    %9 = vector.broadcast %cst_6 : f32 to vector<8x256xf32>
    %10 = arith.maximumf %8, %9 : vector<8x256xf32>
    %c0_7 = arith.constant 0 : index
    %c0_8 = arith.constant 0 : index
    %11 = vector.load %arg3[%c0_7, %c0_8] : memref<8x4xf32, #tpu.memory_space<vmem>>, vector<8x4xf32>
    %c0_9 = arith.constant 0 : index
    %c0_10 = arith.constant 0 : index
    %12 = vector.load %arg8[%c0_9, %c0_10] : memref<4x256xf32, #tpu.memory_space<vmem>>, vector<4x256xf32>
    %cst_11 = arith.constant dense<0.000000e+00> : vector<8x256xf32>
    %13 = tpu.matmul %11, %12, %cst_11 {dimension_numbers = #tpu.dot_dimension_numbers<[1], [0], [0], [1], [0, 0, 1, 1], [], []>} : vector<8x4xf32>, vector<4x256xf32>, vector<8x256xf32> -> vector<8x256xf32>
    %14 = arith.mulf %10, %13 : vector<8x256xf32>
    %c0_12 = arith.constant 0 : index
    %c0_13 = arith.constant 0 : index
    %15 = vector.load %arg10[%c0_12, %c0_13] : memref<8x128xf32, #tpu.memory_space<vmem>>, vector<8x128xf32>
    %c0_14 = arith.constant 0 : index
    %c0_15 = arith.constant 0 : index
    %16 = vector.load %arg6[%c0_14, %c0_15] : memref<256x128xf32, #tpu.memory_space<vmem>>, vector<256x128xf32>
    %cst_16 = arith.constant dense<0.000000e+00> : vector<8x128xf32>
    %17 = tpu.matmul %14, %16, %cst_16 {dimension_numbers = #tpu.dot_dimension_numbers<[1], [0], [0], [1], [0, 0, 1, 1], [], []>} : vector<8x256xf32>, vector<256x128xf32>, vector<8x128xf32> -> vector<8x128xf32>
    %18 = arith.addf %15, %17 : vector<8x128xf32>
    %c0_17 = arith.constant 0 : index
    %c0_18 = arith.constant 0 : index
    %19 = vector.load %arg10[%c0_17, %c0_18] : memref<8x128xf32, #tpu.memory_space<vmem>>, vector<8x128xf32>
    tpu.vector_store %arg10[%c0_17, %c0_18], %18 {strides = array<i32>} : memref<8x128xf32, #tpu.memory_space<vmem>>, vector<8x128xf32>,
    %c1_i32 = arith.constant 1 : i32
    %20 = arith.cmpi eq, %arg1, %c1_i32 : i32
    %21 = arith.extui %20 : i1 to i32
    %c0_i32_19 = arith.constant 0 : i32
    %22 = arith.cmpi ne, %21, %c0_i32_19 : i32
    scf.if %22 {
      %c0_20 = arith.constant 0 : index
      %c0_21 = arith.constant 0 : index
      %23 = vector.load %arg10[%c0_20, %c0_21] : memref<8x128xf32, #tpu.memory_space<vmem>>, vector<8x128xf32>
      %c0_22 = arith.constant 0 : index
      %c0_23 = arith.constant 0 : index
      %24 = vector.load %arg9[%c0_22, %c0_23] : memref<8x128xf32, #tpu.memory_space<vmem>>, vector<8x128xf32>
      tpu.vector_store %arg9[%c0_22, %c0_23], %23 {strides = array<i32>} : memref<8x128xf32, #tpu.memory_space<vmem>>, vector<8x128xf32>,
    } else {
    }
    return
  }
  func.func @transform_0(%arg0: i32, %arg1: i32) -> (i32, i32) {
    %c0_i32 = arith.constant 0 : i32
    %c0_i32_0 = arith.constant 0 : i32
    return %arg0, %c0_i32 : i32, i32
  }
  func.func @transform_1(%arg0: i32, %arg1: i32) -> (i32, i32) {
    %c0_i32 = arith.constant 0 : i32
    %c0_i32_0 = arith.constant 0 : i32
    return %arg0, %c0_i32 : i32, i32
  }
  func.func @transform_2(%arg0: i32, %arg1: i32) -> (i32, i32) {
    %c0_i32 = arith.constant 0 : i32
    %c0_i32_0 = arith.constant 0 : i32
    return %c0_i32, %arg1 : i32, i32
  }
  func.func @transform_3(%arg0: i32, %arg1: i32) -> (i32, i32) {
    %c0_i32 = arith.constant 0 : i32
    %c0_i32_0 = arith.constant 0 : i32
    return %c0_i32, %arg1 : i32, i32
  }
  func.func @transform_4(%arg0: i32, %arg1: i32) -> (i32, i32) {
    %c0_i32 = arith.constant 0 : i32
    %c0_i32_0 = arith.constant 0 : i32
    return %arg1, %c0_i32 : i32, i32
  }
  func.func @transform_5(%arg0: i32, %arg1: i32) -> (i32, i32) {
    %c0_i32 = arith.constant 0 : i32
    %c0_i32_0 = arith.constant 0 : i32
    %c0_i32_1 = arith.constant 0 : i32
    return %c0_i32, %c0_i32_0 : i32, i32
  }
  func.func @transform_6(%arg0: i32, %arg1: i32) -> (i32, i32) {
    %c0_i32 = arith.constant 0 : i32
    %c0_i32_0 = arith.constant 0 : i32
    return %c0_i32, %arg1 : i32, i32
  }
  func.func @transform_7(%arg0: i32, %arg1: i32) -> (i32, i32) {
    %c0_i32 = arith.constant 0 : i32
    %c0_i32_0 = arith.constant 0 : i32
    return %arg0, %c0_i32 : i32, i32
  }
}

</mosaic_0001>

<bundles_post_ra>
// kernel: moe_forward.1
= control target key start
LH: loop header
LB: loop body
LE: loop exit
PB: predicated region body
PF: predicated region fallthrough
CT: control target
= control target key end

     0   :  { %s1649_s0 = inlined_call_operand.hbm [shape: f32[8,32], index: 0, kind: input, shape index: {}]   ;;  %s1650_s1 = inlined_call_operand.vmem [shape: f32[8,4], index: 1, kind: input, shape index: {}]   ;;  %s1651_s2 = inlined_call_operand.vmem [shape: f32[32,512], index: 2, kind: input, shape index: {}]   ;;  %s1652_s3 = inlined_call_operand.vmem [shape: f32[1,512], index: 3, kind: input, shape index: {}]   ;;  %s1653_s4 = inlined_call_operand.hbm [shape: f32[512,128], index: 4, kind: input, shape index: {}]   ;;  %s1654_s5 = inlined_call_operand.hbm [shape: f32[4,128], index: 5, kind: input, shape index: {}]   ;;  %s1655_s6 = inlined_call_operand.hbm [shape: f32[4,512], index: 6, kind: input, shape index: {}]   ;;  %s1656_s7 = inlined_call_operand.hbm [shape: f32[8,128], index: 7, kind: output, shape index: {}]  }
   0x1   :  { %1662 = sst [smem:[#allocation20_spill]] %s1649_s0 }
   0x2   :  { %1663 = sst [smem:[#allocation21_spill]] %s1651_s2 }
   0x3   :  { %1664 = sst [smem:[#allocation22_spill]] %s1653_s4 }
   0x4   :  { %1665 = sst [smem:[#allocation23_spill]] %s1654_s5 }
   0x5   :  { %12 = vsyncpa [#allocation4], 0 }
   0x6   :  { %13 = vsyncpa [#allocation8], 0 }
   0x7   :  { %15 = vsyncpa [#allocation8 + $0x1], 0 }
   0x8   :  { %16 = vsyncpa [#allocation11], 0 }
   0x9   :  { %18 = vsyncpa [#allocation11 + $0x1], 0 }
   0xa   :  { %19 = vsyncpa [#allocation5], 0  ;;  %s1414_s24 = smov 0   ;;  %s1416_s25 = smov 0  }
   0xb   :  { %s1418_s26 = smov 0   ;;  %s1420_s27 = smov 0  }
   0xc   :  { %s1422_s28 = smov 0   ;;  %s1424_s29 = smov 0  }
   0xd LB: > { %s1443_s30 = sadd.s32 4294967295, %s1362_s29   ;;  %s34_s8 = sadd.s32 1, %s1358_s28  ;;  %s1362_s29 = sphi %s1424_s29, %s25_s29   ;;  %s1358_s28 = sphi %s1422_s28, %s1690_s28   ;;  %s1354_s27 = sphi %s1420_s27, %s1689_s27   ;;  %s1350_s26 = sphi %s1418_s26, %s1688_s26   ;;  %s1346_s25 = sphi %s1416_s25, %s1687_s25   ;;  %s1342_s24 = sphi %s1414_s24, %s1686_s24  }
   0xe   : > { %p35_p0 = scmp.ge.s32.totalorder %s34_s8, 2  ;;  %s96_s9 = sadd.s32 1, %s1350_s26 }
   0xf   : > { %p103_p1 = scmp.ne.s32.totalorder %s1350_s26, %s1346_s25  ;;  %p104_p2 = scmp.eq.s32.totalorder %s1362_s29, 0 }
  0x10   : > { %s1692_s8 = smov (%p35_p0, %s34_s8), 0  ;;  %p161_p4 = scmp.ne.s32.totalorder %s1346_s25, %s1342_s24 }
  0x11   : > { %1666 = sst [smem:[#allocation18_spill]] %s1692_s8  ;;  %p1452_p3 = por %p104_p2, %p103_p1 }
  0x12   : > { %s93_s11 = ssub.s32 %s1358_s28, %s1692_s8  ;;  %p1657_p5 = scmp.eq.s32.totalorder %s1443_s30, 0 }
  0x13   : > { %s1667_s10 = scalar_select %p1452_p3, 1, 0 }
  0x14   : > { %p94_p6 = scmp.eq.s32.totalorder %s93_s11, 0  ;;  %p1004_p7 = scmp.ge.s32.totalorder %s1362_s29, 1 }
  0x15   : > { %p1463_p8 = por %p1657_p5, %p161_p4  ;;  %p245_p9 = scmp.lt.s32.totalorder %s1362_s29, 3 }
  0x16   : > { %s1469_s13 = scalar_select %p94_p6, %s1350_s26, %s96_s9  }
  0x17   : > { %s1668_s12 = scalar_select %p1463_p8, 1, 0 }
  0x18   : > { %1669 = sst [smem:[#allocation19_spill]] %s1469_s13  ;;  %p1471_p10 = pnand %p1004_p7, %p245_p9 }
  0x19   : > { %s1364_s15 = smov [#allocation3]   ;;  %s1365_s17 = smov [#allocation9]  }
  0x1a   : > { %s1670_s14 = scalar_select %p1471_p10, 1, 0 }
  0x1b   : > { %p1098_p11 = pneg %p1471_p10  ;;  %s260_s16 = sshll.u32 %s1364_s15, 4  ;;  %s261_s16 = int_to_ptr.vmem [resolvable:$true] %s260_s16 }
  0x1c   : > { %s278_s18 = sshll.u32 %s1365_s17, 4  ;;  %s1179_s20 = scalar_lea.vmem %s261_s16, 128  ;;  %s279_s18 = int_to_ptr.vmem [resolvable:$true] %s278_s18 }
  0x1d   : > { %p1479_p12 = pnand %p1098_p11, %p1657_p5  ;;  %p1180_p0 = scmp.ne.s32.totalorder %s261_s16, %s1179_s20 }
  0x1e   : > { %p1187_p4 = scmp.lt.s32.totalorder %s261_s16, %s261_s16  ;;  %p1188_p6 = scmp.lt.s32.totalorder %s1179_s20, %s1179_s20 }
  0x1f   : > { %p1170_p13 = pneg %p1479_p12 }
  0x20   : > { %p1189_p7 = por %p1188_p6, %p1187_p4 }
  0x21   : > { %p1182_p1 = pnand %p1180_p0, %p1170_p13 }
  0x23   : > { %p1183_p2 = pneg %p1182_p1 }
  0x25   : > { %p1190_p9 = pnand %p1189_p7, %p1183_p2 }
  0x27   : > { %1193 = shalt.err (!%p1190_p9)
}
  0x28   : > { %s1672_s0 = sld [smem:[#allocation20_spill]]  ;;  %s1205_s23 = scalar_lea.vmem %s279_s18, 64 }
  0x29   : > { %p1206_p11 = scmp.ne.s32.totalorder %s279_s18, %s1205_s23  ;;  %p1213_p0 = scmp.lt.s32.totalorder %s279_s18, %s279_s18 }
  0x2a   : > { %p1214_p1 = scmp.lt.s32.totalorder %s1205_s23, %s1205_s23 }
  0x2b   : > { %p1208_p5 = pnand %p1206_p11, %p1170_p13 }
  0x2c   : > { %p1215_p10 = por %p1214_p1, %p1213_p0 }
  0x2d   : > { %p1209_p8 = pneg %p1208_p5 }
  0x2e   : > { %1101 = dma.hbm_to_vmem [thread:$0]  (!%p1479_p12), %s1672_s0, 128, %s261_s16, [#allocation4]  }
  0x2f   : > { %p1216_p3 = pnand %p1215_p10, %p1209_p8 }
  0x31   : > { %1219 = shalt.err (!%p1216_p3)
}
  0x32   : > { %s1673_s5 = sld [smem:[#allocation23_spill]]  ;;  %p1008_p2 = scmp.ge.s32.totalorder %s1362_s29, 2 }
  0x33   : > { %p1674_p4 = scmp.ne.s32.totalorder (!%p1008_p2), %s1667_s10, 0 }
  0x34   : > { %285 = sbr.rel (%p1008_p2) target bundleno = 103 (0x67), region = 28 }
  0x38   : > { %1104 = dma.hbm_to_vmem [thread:$0]  (!%p1479_p12), %s1673_s5, 64, %s279_s18, [#allocation8]  }
  0x39   : > { %288 = sbr.rel (!%p1674_p4) target bundleno = 71 (0x47), region = 32  ;;  %s290_s11 = sand.u32 (%p1674_p4), 1, %s1350_s26  }
  0x3a   : > { %s1037_s15 = sshll.u32 (%p1674_p4), %s1358_s28, 4  ;;  %s1009_s16 = sshll.u32 (%p1674_p4), %s290_s11, 6 }
  0x3b   : > { %s1675_s2 = sld [smem:[#allocation21_spill]] (%p1674_p4)  ;;  %s292_s19 = scalar_lea.vmem (%p1674_p4), [#allocation6], %s1009_s16 }
  0x41   : > { %s295_s21 = scalar_lea.vmem %s1675_s2, %s1037_s15 }
  0x42   : > { %v308_v0 = vld [vmem:[%s295_s21] sm:$0xff]  ;;  %v310_v1 = vld [vmem:[%s295_s21 + $0x8] sm:$0xff] }
  0x43   : > { %v312_v2 = vld [vmem:[%s295_s21 + $0x20] sm:$0xff]  ;;  %309 = vst [vmem:[%s292_s19] sm:$0xff] %v308_v0  ;;  %311 = vst [vmem:[%s292_s19 + $0x8] sm:$0xff] %v310_v1  ;;  %v314_v3 = vld [vmem:[%s295_s21 + $0x28] sm:$0xff] }
  0x44   : > { %313 = vst [vmem:[%s292_s19 + $0x10] sm:$0xff] %v312_v2  ;;  %v316_v4 = vld [vmem:[%s295_s21 + $0x40] sm:$0xff]  ;;  %v318_v5 = vld [vmem:[%s295_s21 + $0x48] sm:$0xff]  ;;  %315 = vst [vmem:[%s292_s19 + $0x18] sm:$0xff] %v314_v3 }
  0x45   : > { %317 = vst [vmem:[%s292_s19 + $0x20] sm:$0xff] %v316_v4  ;;  %319 = vst [vmem:[%s292_s19 + $0x28] sm:$0xff] %v318_v5  ;;  %v320_v6 = vld [vmem:[%s295_s21 + $0x60] sm:$0xff]  ;;  %v322_v7 = vld [vmem:[%s295_s21 + $0x68] sm:$0xff] }
  0x46   : > { %321 = vst [vmem:[%s292_s19 + $0x30] sm:$0xff] %v320_v6  ;;  %323 = vst [vmem:[%s292_s19 + $0x38] sm:$0xff] %v322_v7 }
  0x47 PF: > { %s338_s18 = sand.u32 1, %s1362_s29   ;;  %s1511_s22 = sand.u32 1, %s1350_s26  }
  0x48   : > { %s1012_s23 = sshll.u32 %s1511_s22, 8  ;;  %s1038_s24 = sshll.u32 %s1358_s28, 12 }
  0x49   : > { %s1676_s4 = sld [smem:[#allocation22_spill]]  ;;  %s342_s16 = scalar_lea.vmem [#allocation7], %s1012_s23 }
  0x4a   : > { %s349_s17 = sshll.u32 %s342_s16, 4  ;;  %s339_s20 = scalar_lea.sflag [#allocation8], %s338_s18  ;;  %s350_s17 = int_to_ptr.vmem [resolvable:$true] %s349_s17 }
  0x4b   : > { %s1232_s21 = scalar_lea.vmem %s350_s17, 4096  ;;  %p1677_p5 = scmp.ne.s32.totalorder %s1667_s10, 0 }
  0x4c   : > { %p1233_p3 = scmp.ne.s32.totalorder %s350_s17, %s1232_s21  ;;  %s1366_s19 = smov [#allocation7]  }
  0x4d   : > { %s1236_s0 = sshll.u32 %s1366_s19, 4  ;;  %s1237_s0 = int_to_ptr.vmem [resolvable:$false] %s1236_s0 }
  0x4e   : > { %p1234_p8 = pnand %p1233_p3, %p1677_p5  ;;  %s1238_s2 = scalar_lea.vmem %s1237_s0, 8192 }
  0x4f   : > { %s348_s15 = scalar_lea.hbm %s1676_s4, %s1038_s24  ;;  %p1239_p12 = scmp.lt.s32.totalorder %s350_s17, %s1237_s0 }
  0x50   : > { %p1235_p10 = pneg %p1234_p8  ;;  %p1240_p13 = scmp.lt.s32.totalorder %s1238_s2, %s1232_s21 }
  0x52   : > { %p1241_p6 = por %p1240_p13, %p1239_p12 }
  0x54   : > { %p1242_p7 = pnand %p1241_p6, %p1235_p10 }
  0x56   : > { %1245 = shalt.err (!%p1242_p7)
}
  0x57   : > { %s1367_s9 = smov 128   ;;  %s1368_s18 = smov 8  }
  0x58   : > { %1086 = dma.hbm_to_vmem [thread:$0]  (%p1677_p5), %s348_s15, 4096, %s350_s17, %s339_s20, %s1367_s9, %s1367_s9, %s1368_s18  }
  0x59   : > { %s1015_s23 = sshll.u32 %s1511_s22, 3  ;;  %s1039_s24 = sshll.u32 %s1358_s28, 7 }
  0x5a   : > { %s369_s19 = scalar_lea.hbm %s1655_s6, %s1039_s24  ;;  %s363_s0 = scalar_lea.vmem [#allocation10], %s1015_s23 }
  0x5b   : > { %s371_s2 = sshll.u32 %s363_s0, 4  ;;  %s360_s21 = scalar_lea.sflag [#allocation11], %s1511_s22  ;;  %s372_s2 = int_to_ptr.vmem [resolvable:$true] %s371_s2 }
  0x5c   : > { %s1258_s4 = scalar_lea.vmem %s372_s2, 128  ;;  %s1369_s5 = smov [#allocation10]  }
  0x5d   : > { %p1259_p9 = scmp.ne.s32.totalorder %s372_s2, %s1258_s4  ;;  %s1262_s8 = sshll.u32 %s1369_s5, 4  ;;  %s1263_s8 = int_to_ptr.vmem [resolvable:$false] %s1262_s8 }
  0x5e   : > { %s1264_s13 = scalar_lea.vmem %s1263_s8, 256  ;;  %p1265_p1 = scmp.lt.s32.totalorder %s372_s2, %s1263_s8 }
  0x5f   : > { %p1260_p11 = pnand %p1259_p9, %p1677_p5  ;;  %p1266_p2 = scmp.lt.s32.totalorder %s1264_s13, %s1258_s4 }
  0x61   : > { %p1261_p0 = pneg %p1260_p11  ;;  %p1267_p4 = por %p1266_p2, %p1265_p1 }
  0x63   : > { %p1268_p3 = pnand %p1267_p4, %p1261_p0 }
  0x65   : > { %1271 = shalt.err (!%p1268_p3)
}
  0x66   : > { %1087 = dma.hbm_to_vmem [thread:$0]  (%p1677_p5), %s369_s19, 128, %s372_s2, %s360_s21  }
  0x67 PF: > { %p1678_p8 = scmp.ne.s32.totalorder %s1670_s14, 0 }
  0x68   : > { %p1679_p10 = scmp.eq.s32.totalorder (!%p1678_p8), %s1443_s30, 0 }
  0x69   : > { %380 = sbr.rel (%p1678_p8) target bundleno = 762 (0x2fa), region = 67 }
  0x6e   : > { %1321 = dma.done.wait (%p1679_p10), [#allocation4], 128   ;;  %p1680_p12 = pmov %p1679_p10 }
  0x6f   : > { %s387_s4 = sand.u32 1, %s1346_s25   ;;  %s393_s5 = sand.u32 1, %s1443_s30  }
  0x70   : > { %1323 = vsyncadd (%p1680_p12), [#allocation4], 4294967168  ;;  %s1020_s8 = sshll.u32 %s387_s4, 6  ;;  %s1021_s13 = sshll.u32 %s387_s4, 8 }
  0x71   : > { %s1540_s22 = scalar_lea.vmem [#allocation6], %s1020_s8  ;;  %s394_s10 = scalar_lea.sflag [#allocation8], %s393_s5 }
  0x72   : > { %s1542_s15 = scalar_lea.vmem [#allocation7], %s1021_s13  ;;  %p1681_p5 = scmp.ne.s32.totalorder %s1668_s12, 0 }
  0x74   : > { %1325 = dma.done.wait (%p1681_p5), %s394_s10, 4096  }
  0x75   : > { %1327 = vsyncadd (%p1681_p5), %s394_s10, 4294963200  ;;  %p1682_p13 = pmov %p1679_p10 }
  0x76   : > { %p1683_p6 = pmov %p1679_p10 }
  0x77   : > { %1329 = dma.done.wait (%p1682_p13), [#allocation8], 64  }
  0x78   : > { %1331 = vsyncadd (%p1683_p6), [#allocation8], 4294967232  ;;  %s1023_s14 = sshll.u32 %s387_s4, 3  ;;  %s407_s17 = scalar_lea.sflag [#allocation11], %s387_s4 }
  0x79   : > { %s1552_s20 = scalar_lea.vmem [#allocation10], %s1023_s14 }
  0x7a   : > { %1333 = dma.done.wait (%p1681_p5), %s407_s17, 128  }
  0x7b   : > { %1335 = vsyncadd (%p1681_p5), %s407_s17, 4294967168  ;;  %s1024_s9 = sshll.u32 %s1354_s27, 1  ;;  %p1025_p9 = scmp.ne.s32.totalorder %s1354_s27, 0 }
  0x7c   : > { %p459_p7 = scmp.lt.s32.totalorder %s1024_s9, 3 }
  0x7d   : > { %468 = sbr.rel (%p1025_p9) target bundleno = 328 (0x148), region = 91 }
  0x7e   : > { %s1694_s9 = smov (!%p459_p7, %s1024_s9), 3 }
  0x7f   : > { %s461_s24 = scalar_lea.vmem %s1652_s3, %s1694_s9 }
  0x82   : > { %v470_v8 = vld [vmem:[#allocation9] sm:$0xf]  ;;  %vm475_vm0 = vcmask 1043456   ;;  %v469_v9 = vld [vmem:[%s1650_s1] sm:$0xff]  ;;  %v1370_v10 = vmov 0.0   ;;  %vm1371_vm1 = vmmov 0  }
  0x83   : > { %1077 = vmatprep.subr.mxu0 %v1370_v10  ;;  %1079 = vmatprep.mubr.msk.f32.mxu0 %vm1371_vm1, %v1370_v10  ;;  %vm471_vm2 = vcmask 31744  }
  0x84   : > { %1078 = vmatpush3.msk.msra.mxu0 %vm475_vm0, %v470_v8 }
  0x85   : > { %1080 = vmatmul.mubr.msk.f32.vlgmr.msra.gmra.mxu0 %vm471_vm2, %v469_v9 }
 0x145   : > { %v545_v11 = vpop.f32.mrf.mxu0 }
 0x146   : > { %549 = vst [vmem:[#allocation2] sm:$0xff] %v545_v11 }
 0x147   : > { %v1081_v12 = vpop.f32.mrf.mxu0 }
 0x148 PF: > { %v558_v13 = vld [vmem:[%s1540_s22 + $0x38] sm:$0xff]  ;;  %v557_v14 = vld [vmem:[%s1540_s22 + $0x30] sm:$0xff]  ;;  %v556_v15 = vld [vmem:[%s1540_s22 + $0x28] sm:$0xff]  ;;  %v1372_v17 = vmov 0.0   ;;  %vm571_vm3 = vcmask 261120   ;;  %vm656_vm4 = vcmask 1043456   ;;  %v561_v58 = vlaneseq }
 0x149   : > { %599 = vmatprep.subr.mxu0 %v558_v13  ;;  %v555_v16 = vld [vmem:[%s1540_s22 + $0x20] sm:$0xff]  ;;  %639 = vmatprep.mubr.f32.mxu0 %v1372_v17  ;;  %v554_v18 = vld [vmem:[%s1540_s22 + $0x18] sm:$0xff]  ;;  %v553_v19 = vld [vmem:[%s1540_s22 + $0x10] sm:$0xff]  ;;  %vm652_vm5 = vcmask 31744   ;;  %p1032_p11 = scmp.ne.s32.totalorder %s1354_s27, 1 }
 0x14a   : > { %600 = vmatpush1.msra.mxu0 %v557_v14  ;;  %v552_v20 = vld [vmem:[%s1540_s22 + $0x8] sm:$0xff]  ;;  %v766_v22 = vld [vmem:[%s1542_s15 + $0xf8] sm:$0xff]  ;;  %v765_v24 = vld [vmem:[%s1542_s15 + $0xf0] sm:$0xff]  ;;  %v562_v59 = vshrl.u32 %v561_v58, 7 }
 0x14b   : > { %601 = vmatprep.subr.mxu0 %v556_v15  ;;  %v649_v21 = vld [vmem:[%s1552_s20] sm:$0xff]  ;;  %1042 = vmatprep.subr.mxu1 %v766_v22  ;;  %v750_v23 = vld [vmem:[%s1542_s15 + $0x78] sm:$0xff] }
 0x14c   : > { %602 = vmatpush1.msra.mxu0 %v555_v16  ;;  %v749_v25 = vld [vmem:[%s1542_s15 + $0x70] sm:$0xff]  ;;  %v551_v26 = vld [vmem:[%s1540_s22] sm:$0xff]  ;;  %v651_v27 = vcombine.high %v649_v21, %v649_v21  ;;  %1043 = vmatpush3.msra.mxu1 %v750_v23  ;;  %v764_v28 = vld [vmem:[%s1542_s15 + $0xe8] sm:$0xff]  ;;  %v563_v60 = vsub.s32 0, %v562_v59  ;;  %v567_v62 = vsub.s32 1, %v562_v59 }
 0x14d   : > { %603 = vmatprep.subr.mxu0 %v554_v18  ;;  %v550_v29 = vld [vmem:[#allocation3] sm:$0xff]  ;;  %1044 = vmatprep.subr.mxu1 %v765_v24  ;;  %v748_v30 = vld [vmem:[%s1542_s15 + $0x68] sm:$0xff]  ;;  %v763_v31 = vld [vmem:[%s1542_s15 + $0xe0] sm:$0xff] }
 0x14e   : > { %604 = vmatpush1.msra.mxu0 %v553_v19  ;;  %1045 = vmatpush3.msra.mxu1 %v749_v25  ;;  %v648_v32 = vld [vmem:[%s1650_s1] sm:$0xff]  ;;  %v747_v33 = vld [vmem:[%s1542_s15 + $0x60] sm:$0xff]  ;;  %v762_v34 = vld [vmem:[%s1542_s15 + $0xd8] sm:$0xff] }
 0x14f   : > { %605 = vmatprep.subr.mxu0 %v552_v20  ;;  %1046 = vmatprep.subr.mxu1 %v764_v28  ;;  %v746_v35 = vld [vmem:[%s1542_s15 + $0x58] sm:$0xff]  ;;  %v761_v36 = vld [vmem:[%s1542_s15 + $0xd0] sm:$0xff]  ;;  %v760_v38 = vld [vmem:[%s1542_s15 + $0xc8] sm:$0xff] }
 0x150   : > { %606 = vmatpush1.msra.mxu0 %v551_v26  ;;  %1047 = vmatpush3.msra.mxu1 %v748_v30  ;;  %v745_v37 = vld [vmem:[%s1542_s15 + $0x50] sm:$0xff]  ;;  %v744_v39 = vld [vmem:[%s1542_s15 + $0x48] sm:$0xff]  ;;  %v759_v40 = vld [vmem:[%s1542_s15 + $0xc0] sm:$0xff] }
 0x151   : > { %1028 = vmatmul.mubr.msk.f32.vlgmr.msra.gmra.mxu0 %vm571_vm3, %v550_v29  ;;  %1029 = vmatprep.subr.msk.mxu0 %vm656_vm4, %v651_v27  ;;  %v743_v41 = vld [vmem:[%s1542_s15 + $0x40] sm:$0xff]  ;;  %v758_v42 = vld [vmem:[%s1542_s15 + $0xb8] sm:$0xff]  ;;  %v757_v44 = vld [vmem:[%s1542_s15 + $0xb0] sm:$0xff] }
 0x152   : > { %1030 = vmatpush1.msk.msra.mxu0 %vm656_vm4, %v649_v21  ;;  %725 = vmatprep.mubr.f32.mxu0 %v1372_v17  ;;  %v742_v43 = vld [vmem:[%s1542_s15 + $0x38] sm:$0xff]  ;;  %v741_v45 = vld [vmem:[%s1542_s15 + $0x30] sm:$0xff]  ;;  %v756_v46 = vld [vmem:[%s1542_s15 + $0xa8] sm:$0xff] }
 0x153   : > { %1048 = vmatprep.subr.mxu1 %v763_v31  ;;  %v740_v47 = vld [vmem:[%s1542_s15 + $0x28] sm:$0xff]  ;;  %v755_v48 = vld [vmem:[%s1542_s15 + $0xa0] sm:$0xff]  ;;  %v754_v50 = vld [vmem:[%s1542_s15 + $0x98] sm:$0xff] }
 0x154   : > { %1049 = vmatpush3.msra.mxu1 %v747_v33  ;;  %v739_v49 = vld [vmem:[%s1542_s15 + $0x20] sm:$0xff]  ;;  %v738_v51 = vld [vmem:[%s1542_s15 + $0x18] sm:$0xff]  ;;  %v753_v52 = vld [vmem:[%s1542_s15 + $0x90] sm:$0xff] }
 0x155   : > { %1031 = vmatmul.mubr.msk.f32.vlgmr.msra.gmra.mxu0 %vm652_vm5, %v648_v32  ;;  %1050 = vmatprep.subr.mxu1 %v762_v34  ;;  %v737_v53 = vld [vmem:[%s1542_s15 + $0x10] sm:$0xff]  ;;  %v752_v54 = vld [vmem:[%s1542_s15 + $0x88] sm:$0xff]  ;;  %v751_v56 = vld [vmem:[%s1542_s15 + $0x80] sm:$0xff] }
 0x156   : > { %1051 = vmatpush3.msra.mxu1 %v746_v35  ;;  %v736_v55 = vld [vmem:[%s1542_s15 + $0x8] sm:$0xff]  ;;  %v735_v57 = vld [vmem:[%s1542_s15] sm:$0xff]  ;;  %v559_v61 = vld [vmem:[%s461_s24] sm:$0x3] }
 0x157   : > { %1052 = vmatprep.subr.mxu1 %v761_v36  ;;  %v564_v63 = vrot.slane %v559_v61, %v563_v60  ;;  %v568_v0 = vrot.slane %v559_v61, %v567_v62  ;;  %v734_v12 = vld [vmem:[#allocation2] sm:$0xff] }
 0x158   : > { %1053 = vmatpush3.msra.mxu1 %v745_v37 }
 0x159   : > { %1054 = vmatprep.subr.mxu1 %v760_v38 }
 0x15a   : > { %1055 = vmatpush3.msra.mxu1 %v744_v39 }
 0x15b   : > { %1056 = vmatprep.subr.mxu1 %v759_v40 }
 0x15c   : > { %1057 = vmatpush3.msra.mxu1 %v743_v41 }
 0x15d   : > { %1058 = vmatprep.subr.mxu1 %v758_v42 }
 0x15e   : > { %1059 = vmatpush3.msra.mxu1 %v742_v43 }
 0x15f   : > { %1060 = vmatprep.subr.mxu1 %v757_v44 }
 0x160   : > { %1061 = vmatpush3.msra.mxu1 %v741_v45 }
 0x161   : > { %1062 = vmatprep.subr.mxu1 %v756_v46 }
 0x162   : > { %1063 = vmatpush3.msra.mxu1 %v740_v47 }
 0x163   : > { %1064 = vmatprep.subr.mxu1 %v755_v48 }
 0x164   : > { %1065 = vmatpush3.msra.mxu1 %v739_v49 }
 0x165   : > { %1066 = vmatprep.subr.mxu1 %v754_v50 }
 0x166   : > { %1067 = vmatpush3.msra.mxu1 %v738_v51 }
 0x167   : > { %1068 = vmatprep.subr.mxu1 %v753_v52 }
 0x168   : > { %1069 = vmatpush3.msra.mxu1 %v737_v53 }
 0x169   : > { %1070 = vmatprep.subr.mxu1 %v752_v54 }
 0x16a   : > { %1071 = vmatpush3.msra.mxu1 %v736_v55 }
 0x16b   : > { %1072 = vmatprep.subr.mxu1 %v751_v56 }
 0x16c   : > { %1073 = vmatpush3.msra.mxu1 %v735_v57 }
 0x211   : > { %v641_v1 = vpop.f32.mrf.mxu0 }
 0x212   : > { %v642_v2 = vadd.f32 %v641_v1, %v564_v63 }
 0x213   : > { %v643_v3 = vpop.f32.mrf.mxu0 }
 0x214   : > { %v644_v4 = vadd.f32 %v643_v3, %v568_v0  ;;  %v646_v5 = vmax.f32 %v642_v2, 0.0 }
 0x215   : > { %v727_v6 = vpop.f32.mrf.mxu0 }
 0x216   : > { %v647_v7 = vmax.f32 %v644_v4, 0.0  ;;  %v732_v10 = vmul.f32 %v727_v6, %v646_v5 }
 0x217   : > { %v729_v8 = vpop.f32.mrf.mxu0 }
 0x218   : > { %v733_v9 = vmul.f32 %v729_v8, %v647_v7 }
 0x21a   : > { %831 = vmatprep.mubr.f32.mxu1 %v733_v9 }
 0x21b   : > { %832 = vmatmul.mubr.f32.vlgmr.msra.gmra.mxu1 %v732_v10 }
 0x2db   : > { %v1074_v11 = vpop.f32.mrf.mxu1 }
 0x2dd   : > { %v1075_v13 = vpop.f32.mrf.mxu1 }
 0x2de   : > { %v1076_v14 = vadd.f32 %v1075_v13, %v1074_v11  ;;  %842 = sbr.rel (%p1032_p11) target bundleno = 747 (0x2eb), region = 95 }
 0x2e0   : > { %v837_v15 = vadd.f32 %v1076_v14, %v734_v12 }
 0x2e2   : > { %838 = vst [vmem:[#allocation2] sm:$0xff] %v837_v15 }
 0x2e9   : > { %v843_v16 = vld [vmem:[#allocation2] sm:$0xff] }
 0x2ea   : > { %844 = vst [vmem:[#allocation12] sm:$0xff] %v843_v16 }
 0x2eb PF: > { %p1109_p0 = scmp.eq.s32.totalorder %s1443_s30, 1  ;;  %s1373_s21 = smov [#allocation12]  }
 0x2ec   : > { %s854_s4 = sshll.u32 %s1373_s21, 4  ;;  %s855_s4 = int_to_ptr.vmem [resolvable:$true] %s854_s4 }
 0x2ed   : > { %s1272_s5 = scalar_lea.vmem %s855_s4, 128  ;;  %p1279_p3 = scmp.lt.s32.totalorder %s855_s4, %s855_s4 }
 0x2ee   : > { %p1273_p1 = scmp.ne.s32.totalorder %s855_s4, %s1272_s5  ;;  %p1280_p8 = scmp.lt.s32.totalorder %s1272_s5, %s1272_s5 }
 0x2f0   : > { %p1274_p2 = pnand %p1273_p1, %p1109_p0  ;;  %p1281_p10 = por %p1280_p8, %p1279_p3 }
 0x2f2   : > { %p1275_p4 = pneg %p1274_p2 }
 0x2f4   : > { %p1282_p12 = pnand %p1281_p10, %p1275_p4 }
 0x2f6   : > { %1285 = shalt.err (!%p1282_p12)
}
 0x2f7   : > { %1095 = dma.vmem_to_hbm [thread:$0]  (%p1109_p0), %s855_s4, 128, %s1656_s7, [#allocation5]  }
 0x2f8   : > { %1337 = dma.done.wait (%p1109_p0), [#allocation5], 128  }
 0x2f9   : > { %1339 = vsyncadd (%p1109_p0), [#allocation5], 4294967168 }
 0x2fa PF: > { %s25_s29 = sadd.s32 1, %s1362_s29   ;;  %s1684_s13 = sld [smem:[#allocation19_spill]] }
 0x2fb   : > { %p22_p5 = scmp.ge.s32.totalorder %s25_s29, 4   ;;  %s1685_s22 = sld [smem:[#allocation18_spill]] }
 0x2fc   : > { %s1686_s24 = smov %s1346_s25  ;;  %s1687_s25 = smov %s1350_s26 }
 0x2fd   : > { %s1689_s27 = smov %s1358_s28  ;;  %24 = sbr.rel (!%p22_p5) target bundleno = 13 (0xd), region = 154 }
 0x300   : > { %s1688_s26 = smov %s1684_s13 }
 0x301   : > { %s1690_s28 = smov %s1685_s22 }
 0x302   :  { %867 = vsyncpa [#allocation4], 1 }
 0x303   :  { %869 = vsyncpa [#allocation4 + $0x1], 1 }
 0x304   :  { %870 = vsyncpa [#allocation8], 1 }
 0x305   :  { %872 = vsyncpa [#allocation8 + $0x1], 1 }
 0x306   :  { %873 = vsyncpa [#allocation11], 1 }
 0x307   :  { %875 = vsyncpa [#allocation11 + $0x1], 1 }
 0x308   :  { %876 = vsyncpa [#allocation5], 1 }
 0x309   :  { %878 = vsyncpa [#allocation5 + $0x1], 1 }

</bundles_post_ra>
